<compile_context>
chip_gen: v7x
topology: tpu7x:2x2x1
jax: 0.10.0
libtpu: 0.0.40
codegen_flags: <defaults>
</compile_context>

<pallas_src>
import functools

import jax
import jax.numpy as jnp
from jax.experimental import pallas as pl
from jax.experimental.pallas import tpu as pltpu


def _round_up(x, m):
    return ((x + m - 1) // m) * m


def _cdiv(a, b):
    return (a + b - 1) // b


# VMEM budget for the double-buffered (output, positions) block pairs.
_PAIR_VMEM_BUDGET = 20 * 1024 * 1024
# Only force a 2-way split (for v7x megacore) when the output is at least this
# big, so the extra grid step is negligible on single-TC v5e/v6e.
_SPLIT_THRESHOLD = 4 * 1024 * 1024


def _choose_tile(S, demb, out_bytes):
    """Pick the sequence tile TS (multiple of 8), VMEM- and megacore-aware."""
    s8 = _round_up(S, 8)
    # Per-row VMEM cost of one buffered pair: output row + lane-padded pos row.
    per_row = demb * out_bytes + 128 * 4
    rows_cap = max(8, (_PAIR_VMEM_BUDGET // (2 * per_row)) // 8 * 8)
    ts = max(8, min(s8, rows_cap))
    if ts >= s8:
        # Whole output fits one tile. Split 2-way only when the tile is large
        # enough that the extra ~0.35us step is noise (feeds both v7x TCs).
        if s8 >= 16 and s8 * demb * out_bytes >= _SPLIT_THRESHOLD:
            ts = max(8, _round_up(_cdiv(s8, 2), 8))
    else:
        # Multi-step anyway: prefer an even step count so the two v7x
        # TensorCores get balanced work under dimension_semantics=("parallel",).
        n = _cdiv(s8, ts)
        if n % 2 == 1:
            ts = max(8, _round_up(_cdiv(s8, n + 1), 8))
    return ts


def _pos_emb_kernel(pos_ref, invf_ref, out_ref, *, h):
    # pos_ref : [TS, 1] f32 — this step's tile of positions (DMA hidden behind
    #                          the previous step's output writeback)
    # invf_ref: [1, H]  f32 — resident inverse frequencies (same block every step)
    # out_ref : [TS, 2H]    — sin | cos halves on the lane axis
    sinusoid = pos_ref[...] * invf_ref[...]          # outer product -> [TS, H], f32
    # Direct half-slab writes; static Ref slices are free (no concat temporary).
    out_ref[:, :h] = jnp.sin(sinusoid).astype(out_ref.dtype)
    out_ref[:, h:] = jnp.cos(sinusoid).astype(out_ref.dtype)


@functools.partial(
    jax.jit, static_argnames=("demb", "bsz", "out_dtype", "tile_rows")
)
def positional_embedding(pos_seq, inv_freq, *, demb, bsz=None,
                         out_dtype=jnp.float32, tile_rows=None):
    """pos_seq: [S] float, inv_freq: [demb//2] float -> [1 or bsz, S, demb].

    out_dtype=jnp.bfloat16 halves HBM writeback bytes (compute stays f32).
    tile_rows overrides the automatic sequence-tile choice (testing/tuning).
    """
    assert demb % 2 == 0, "demb must be even (sin|cos halves)"
    S = pos_seq.shape[0]
    H = demb // 2

    out_bytes = jnp.dtype(out_dtype).itemsize
    TS = tile_rows if tile_rows is not None else _choose_tile(S, demb, out_bytes)
    TS = max(8, _round_up(TS, 8))
    grid_len = _cdiv(S, TS)
    S_total = grid_len * TS  # pad positions so every (TS,1) input block is in range

    pos2d = jnp.pad(pos_seq.astype(jnp.float32), (0, S_total - S)).reshape(S_total, 1)
    invf2d = inv_freq.reshape(1, H).astype(jnp.float32)

    # Explicit VMEM budget: 2x out tile + 2x lane-padded pos tile + invf + headroom,
    # so the large tiles land on v5e's 16 MiB scoped default as well as v6e/v7x.
    out_tile_b = TS * demb * out_bytes
    pos_tile_b = TS * 128 * 4
    invf_b = 8 * _round_up(H, 128) * 4
    budget = 2 * out_tile_b + 2 * pos_tile_b + invf_b + (4 << 20)
    vmem_limit = int(min(64 << 20, max(24 << 20, budget)))

    kernel = functools.partial(_pos_emb_kernel, h=H)

    pos_emb = pl.pallas_call(
        kernel,
        out_shape=jax.ShapeDtypeStruct((S, demb), out_dtype),
        grid_spec=pltpu.PrefetchScalarGridSpec(
            num_scalar_prefetch=0,
            grid=(grid_len,),
            in_specs=[
                # Positions: one small (TS,1) tile per step — per-step DMA is
                # trivially hidden behind the output writeback.
                pl.BlockSpec((TS, 1), lambda i: (i, 0)),
                # Inverse frequencies: tiny, same block every step (resident).
                pl.BlockSpec((1, H), lambda i: (0, 0)),
            ],
            out_specs=pl.BlockSpec((TS, demb), lambda i: (i, 0)),
        ),
        compiler_params=pltpu.CompilerParams(
            dimension_semantics=("parallel",),
            vmem_limit_bytes=vmem_limit,
        ),
    )(pos2d, invf2d)

    pos_emb = pos_emb[None, :, :]  # [1, S, D]
    if bsz is not None:
        # Matches torch .expand(bsz, -1, -1). Perf note: prefer bsz=None and
        # broadcast at the consumer to avoid bsz x HBM write traffic.
        pos_emb = jnp.broadcast_to(pos_emb, (bsz, S, demb))
    return pos_emb


def make_inv_freq(demb):
    # Deterministic "parameter" init, identical to the PyTorch buffer.
    return 1.0 / (10000.0 ** (jnp.arange(0.0, demb, 2.0) / demb))


def _reference(pos_seq, inv_freq, bsz=None):
    sinusoid = jnp.outer(pos_seq, inv_freq)
    pos_emb = jnp.concatenate([jnp.sin(sinusoid), jnp.cos(sinusoid)], axis=-1)
    pos_emb = pos_emb[None, :, :]
    if bsz is not None:
        pos_emb = jnp.broadcast_to(pos_emb, (bsz,) + pos_emb.shape[1:])
    return pos_emb


if __name__ == "__main__":
    key = jax.random.PRNGKey(0)

    # Case 1: tiny shapes implied by the module demo (seq=8, demb=32, bsz=2).
    demb, seq, bsz = 32, 8, 2
    pos_seq = jnp.arange(seq - 1, -1, -1.0, dtype=jnp.float32)
    pos_seq = pos_seq + 0.01 * jax.random.normal(key, (seq,), dtype=jnp.float32)
    inv_freq = make_inv_freq(demb)

    out = positional_embedding(pos_seq, inv_freq, demb=demb, bsz=bsz)
    out = jax.block_until_ready(out)
    ref = _reference(pos_seq, inv_freq, bsz=bsz)
    assert out.shape == (bsz, seq, demb), out.shape
    assert jnp.allclose(out, ref, atol=5e-4, rtol=1e-4), "mismatch vs reference (case 1)"

    # Case 2: production-like demb (lane-dense half writes, H=128), multi-step
    # grid with an even step count and a partial last output block
    # (tile_rows=64 forces grid=4, last block uses 8 of 64 rows).
    demb2, seq2 = 256, 200
    pos_seq2 = jnp.arange(seq2 - 1, -1, -1.0, dtype=jnp.float32)
    inv_freq2 = make_inv_freq(demb2)

    out2 = positional_embedding(pos_seq2, inv_freq2, demb=demb2, tile_rows=64)
    out2 = jax.block_until_ready(out2)
    ref2 = _reference(pos_seq2, inv_freq2)
    assert out2.shape == (1, seq2, demb2), out2.shape
    assert jnp.allclose(out2, ref2, atol=5e-4, rtol=1e-4), "mismatch vs reference (case 2)"

    # Case 3: bf16 output path (halved HBM writeback; compute still f32).
    demb3, seq3 = 64, 40
    pos_seq3 = jnp.arange(seq3 - 1, -1, -1.0, dtype=jnp.float32)
    inv_freq3 = make_inv_freq(demb3)

    out3 = positional_embedding(pos_seq3, inv_freq3, demb=demb3,
                                out_dtype=jnp.bfloat16)
    out3 = jax.block_until_ready(out3)
    ref3 = _reference(pos_seq3, inv_freq3).astype(jnp.bfloat16)
    assert out3.shape == (1, seq3, demb3), out3.shape
    assert out3.dtype == jnp.bfloat16
    assert jnp.allclose(out3.astype(jnp.float32), ref3.astype(jnp.float32),
                        atol=2e-2, rtol=2e-2), "mismatch vs reference (case 3)"

    print("KERNEL_OK")
</pallas_src>

<mosaic_0001>
module attributes {stable_mosaic.version = 11 : i64} {
  func.func @_pos_emb_kernel(%arg0: i32, %arg1: memref<8x1xf32, #tpu.memory_space<vmem>>, %arg2: memref<1x16xf32, #tpu.memory_space<vmem>>, %arg3: memref<8x32xf32, #tpu.memory_space<vmem>>) attributes {dimension_semantics = [#tpu.dimension_semantics<parallel>], iteration_bounds = array<i64: 1>, scalar_prefetch = 0 : i64, scratch_operands = 0 : i64, tpu.core_type = #tpu.core_type<tc>, window_params = [{transform_indices = @transform_0, window_bounds = array<i64: 8, 1>}, {pipeline_mode = #tpu.pipeline_mode<synchronous>, transform_indices = @transform_1, window_bounds = array<i64: 1, 16>}, {transform_indices = @transform_2, window_bounds = array<i64: 8, 32>}]} {
    %c0 = arith.constant 0 : index
    %c0_0 = arith.constant 0 : index
    %0 = vector.load %arg1[%c0, %c0_0] : memref<8x1xf32, #tpu.memory_space<vmem>>, vector<8x1xf32>
    %c0_1 = arith.constant 0 : index
    %c0_2 = arith.constant 0 : index
    %1 = vector.load %arg2[%c0_1, %c0_2] : memref<1x16xf32, #tpu.memory_space<vmem>>, vector<1x16xf32>
    %2 = vector.broadcast %0 : vector<8x1xf32> to vector<8x16xf32>
    %3 = vector.broadcast %1 : vector<1x16xf32> to vector<8x16xf32>
    %4 = arith.mulf %2, %3 : vector<8x16xf32>
    %5 = math.sin %4 : vector<8x16xf32>
    %c0_3 = arith.constant 0 : index
    %c0_4 = arith.constant 0 : index
    %6 = vector.load %arg3[%c0_3, %c0_4] : memref<8x32xf32, #tpu.memory_space<vmem>>, vector<8x16xf32>
    tpu.vector_store %arg3[%c0_3, %c0_4], %5 {strides = array<i32>} : memref<8x32xf32, #tpu.memory_space<vmem>>, vector<8x16xf32>,
    %7 = math.cos %4 : vector<8x16xf32>
    %c0_5 = arith.constant 0 : index
    %c16 = arith.constant 16 : index
    %8 = vector.load %arg3[%c0_5, %c16] : memref<8x32xf32, #tpu.memory_space<vmem>>, vector<8x16xf32>
    tpu.vector_store %arg3[%c0_5, %c16], %7 {strides = array<i32>} : memref<8x32xf32, #tpu.memory_space<vmem>>, vector<8x16xf32>,
    return
  }
  func.func @transform_0(%arg0: i32) -> (i32, i32) {
    %c0_i32 = arith.constant 0 : i32
    %c0_i32_0 = arith.constant 0 : i32
    return %arg0, %c0_i32 : i32, i32
  }
  func.func @transform_1(%arg0: i32) -> (i32, i32) {
    %c0_i32 = arith.constant 0 : i32
    %c0_i32_0 = arith.constant 0 : i32
    %c0_i32_1 = arith.constant 0 : i32
    return %c0_i32, %c0_i32_0 : i32, i32
  }
  func.func @transform_2(%arg0: i32) -> (i32, i32) {
    %c0_i32 = arith.constant 0 : i32
    %c0_i32_0 = arith.constant 0 : i32
    return %arg0, %c0_i32 : i32, i32
  }
}

</mosaic_0001>

<bundles_post_ra>
// kernel: positional_embedding.1
= control target key start
LH: loop header
LB: loop body
LE: loop exit
PB: predicated region body
PF: predicated region fallthrough
CT: control target
= control target key end

     0   :  { %v270_v0 = vmov 0   ;;  %v271_v15 = vmov 683565275   ;;  %v272_v17 = vmov 2475754826   ;;  %vm129_vm10 = vcmask 130048   ;;  %s327_s0 = inlined_call_operand.vmem [shape: f32[8,1], index: 0, kind: input, shape index: {}]   ;;  %s328_s1 = inlined_call_operand.vmem [shape: f32[1,16], index: 1, kind: input, shape index: {}]   ;;  %s329_s2 = inlined_call_operand.vmem [shape: f32[8,32], index: 2, kind: output, shape index: {}]  }
   0x1   :  { %265 = vset.pattern.permute.xlu0 %v270_v0  ;;  %v11_v1 = vld [vmem:[%s327_s0] sm:$0xff]  ;;  %v273_v20 = vmov 2131351028   ;;  %v274_v23 = vmov 2102212464   ;;  %s277_s0 = smov 16  }
   0x2   :  { %15 = vperm.xlu0 %265, %v11_v1   ;;  %v244_v2 = vld [vmem:[%s328_s1] ss:$0 sm:$0xff]  ;;  %v275_v26 = vmov 920167782   ;;  %v276_v29 = vmov 1326507024  }
  0x81   :  { %v16_v3 = vpop.permute.xlu0 %15 }
  0x82   :  { %v299_v4 = vmul.f32 %v244_v2, %v16_v3 }
  0x84   :  { %v28_v5 = vand.u32 2139095040, %v299_v4  ;;  %v25_v9 = vand.u32 2147483647, %v299_v4  ;;  %vm27_vm7 = vcmp.lt.s32.totalorder %v299_v4, 0 }
  0x86   :  { %v29_v6 = vshrl.u32 %v28_v5, 23  ;;  %v32_v12 = vand.u32 8388607, %v25_v9  ;;  %vm26_vm8 = vcmp.le.f32.partialorder %v25_v9, 0.7853982 }
  0x88   :  { %v245_v7 = vadd.s32 4294967169, %v29_v6  ;;  %v33_v31 = vor.u32 8388608, %v32_v12 }
  0x8a   :  { %v35_v8 = vadd.s32 1, %v245_v7  ;;  %v73_v45 = vshll.u32 %v33_v31, 8 }
  0x8c   :  { %vm36_vm0 = vcmp.gt.s32.totalorder %v35_v8, 0 }
  0x8d   :  { %v37_v10 = vsel %vm36_vm0, %v35_v8, 0  ;;  %vm117_vm0 = vweird.f32 %v299_v4 }
  0x8e   :  { %v39_v11 = vand.u32 31, %v37_v10  ;;  %v38_v14 = vshrl.u32 %v37_v10, 5 }
  0x90   :  { %v40_v13 = vsub.s32 32, %v39_v11  ;;  %v42_v16 = vshll.u32 %v271_v15, %v39_v11  ;;  %v45_v18 = vshll.u32 %v272_v17, %v39_v11  ;;  %v48_v22 = vshll.u32 %v273_v20, %v39_v11 }
  0x91   :  { %v51_v25 = vshll.u32 %v274_v23, %v39_v11  ;;  %v54_v28 = vshll.u32 %v275_v26, %v39_v11  ;;  %vm57_vm1 = vcmp.lt.s32.totalorder %v38_v14, 1  ;;  %vm60_vm2 = vcmp.lt.s32.totalorder %v38_v14, 4 }
  0x92   :  { %v43_v19 = vshrl.u32 %v272_v17, %v40_v13  ;;  %v46_v21 = vshrl.u32 %v273_v20, %v40_v13  ;;  %v49_v24 = vshrl.u32 %v274_v23, %v40_v13  ;;  %v52_v27 = vshrl.u32 %v275_v26, %v40_v13 }
  0x93   :  { %v55_v30 = vshrl.u32 %v276_v29, %v40_v13  ;;  %v41_v40 = vshrl.u32 %v271_v15, %v40_v13  ;;  %vm59_vm3 = vcmp.lt.s32.totalorder %v38_v14, 3  ;;  %vm58_vm4 = vcmp.lt.s32.totalorder %v38_v14, 2 }
  0x94   :  { %v44_v32 = vor.u32 %v43_v19, %v42_v16  ;;  %v47_v33 = vor.u32 %v46_v21, %v45_v18  ;;  %v50_v34 = vor.u32 %v49_v24, %v48_v22  ;;  %v53_v35 = vor.u32 %v52_v27, %v51_v25 }
  0x95   :  { %v56_v36 = vor.u32 %v55_v30, %v54_v28 }
  0x96   :  { %v62_v37 = vsel %vm60_vm2, %v50_v34, 2102212464  ;;  %v65_v38 = vsel %vm57_vm1, %v44_v32, %v47_v33  ;;  %v69_v39 = vsel %vm57_vm1, %v47_v33, %v50_v34  ;;  %v66_v41 = vsel %vm60_vm2, %v53_v35, 920167782 }
  0x97   :  { %v70_v42 = vsel %vm60_vm2, %v56_v36, 1326507024  ;;  %v67_v43 = vsel %vm59_vm3, %v50_v34, %v66_v41  ;;  %v61_v46 = vsel %vm57_vm1, %v41_v40, %v44_v32  ;;  %v63_v47 = vsel %vm59_vm3, %v47_v33, %v62_v37 }
  0x98   :  { %v71_v44 = vsel %vm59_vm3, %v53_v35, %v70_v42  ;;  %v68_v48 = vsel %vm58_vm4, %v65_v38, %v67_v43  ;;  %v64_v54 = vsel %vm58_vm4, %v61_v46, %v63_v47  ;;  %vm238_vm1 = vcmask 261248  }
  0x99   :  { %v72_v49 = vsel %vm58_vm4, %v69_v39, %v71_v44  ;;  %v308_v52 = vmul.u32.u64.low %v73_v45, %v68_v48  ;;  %v309_v53 = vmul.u32.u64.high %v73_v45, %v68_v48, %v308_v52  ;;  %v80_v56 = vmul.u32 %v73_v45, %v64_v54 }
  0x9a   :  { %v305_v50 = vmul.u32.u64.low %v73_v45, %v72_v49  ;;  %v306_v51 = vmul.u32.u64.high %v73_v45, %v72_v49, %v305_v50 }
  0x9b   :  { %v83_v55 = vadd.s32 1, %v309_v53 }
  0x9c   :  { %vm82_vm5 = vc.u32 %v306_v51, %v308_v52  ;;  %v81_v5 = vadd.s32 %v308_v52, %v306_v51 }
  0x9d   :  { %v84_v57 = vsel %vm82_vm5, %v83_v55, %v309_v53 }
  0x9e   :  { %v85_v58 = vadd.s32 %v84_v57, %v80_v56 }
  0xa0   :  { %v86_v59 = vadd.s32 536870912, %v85_v58 }
  0xa2   :  { %v87_v60 = vshrl.u32 %v86_v59, 30 }
  0xa4   :  { %v88_v61 = vshll.u32 %v87_v60, 30  ;;  %v111_v18 = vsub.s32 4, %v87_v60 }
  0xa6   :  { %v89_v62 = vsub.s32 %v85_v58, %v88_v61  ;;  %v112_v21 = vsel %vm27_vm7, %v111_v18, %v87_v60 }
  0xa7   :  { %v114_v23 = vsel %vm26_vm8, 0, %v112_v21 }
  0xa8   :  { %v91_v63 = vsub.s32 0, %v89_v62  ;;  %v118_v24 = vadd.s32 3, %v114_v23  ;;  %v224_v26 = vand.u32 3, %v114_v23 }
  0xaa   :  { %v246_v0 = vmin.u32 %v91_v63, %v89_v62  ;;  %v119_v25 = vand.u32 3, %v118_v24  ;;  %vm229_vm11 = vcmp.eq.s32.totalorder %v224_v26, 2  ;;  %vm226_vm13 = vcmp.eq.s32.totalorder %v224_v26, 0 }
  0xab   :  { %vm225_vm15 = vcmp.lt.s32.totalorder %v224_v26, 2 }
  0xac   :  { %v93_v1 = vclz %v246_v0  ;;  %vm124_vm9 = vcmp.eq.s32.totalorder %v119_v25, 2  ;;  %vm121_vm12 = vcmp.eq.s32.totalorder %v119_v25, 0  ;;  %vm120_vm14 = vcmp.lt.s32.totalorder %v119_v25, 2 }
  0xae   :  { %v247_v2 = vadd.s32 4294967294, %v93_v1 }
  0xb0   :  { %vm248_vm6 = vcmp.lt.s32.totalorder %v247_v2, 0 }
  0xb1   :  { %v96_v3 = vsel %vm248_vm6, 0, %v247_v2 }
  0xb2   :  { %v97_v6 = vsub.s32 32, %v96_v3  ;;  %v101_v7 = vsub.s32 4294967266, %v96_v3  ;;  %v98_v8 = vshll.u32 %v89_v62, %v96_v3 }
  0xb4   :  { %v99_v10 = vshrl.u32 %v81_v5, %v97_v6  ;;  %v102_v11 = vadd.s32 127, %v101_v7 }
  0xb6   :  { %v100_v12 = vor.u32 %v99_v10, %v98_v8  ;;  %v103_v13 = vshll.u32 %v102_v11, 23 }
  0xb8   :  { %v104_v14 = vor.u32 4788187, %v103_v13  ;;  %v107_v16 = vcvt.s32.f32 %v100_v12 }
  0xba   :  { %v105_v15 = vand.u32 2147483647, %v104_v14 }
  0xbc   :  { %v108_v17 = vmul.f32 %v107_v16, %v105_v15 }
  0xbe   :  { %v109_v19 = vxor.u32 2147483648, %v108_v17 }
  0xc0   :  { %v110_v20 = vsel %vm27_vm7, %v109_v19, %v108_v17 }
  0xc1   :  { %v113_v22 = vsel %vm26_vm8, %v299_v4, %v110_v20 }
  0xc2   :  { %266 = vcosq.f32 %v113_v22 }
  0xc3   :  { %268 = vsinq.f32 %v113_v22 }
  0xcc   :  { %v267_v27 = vpop.eup %266 }
  0xcd   :  { %v269_v28 = vpop.eup %268  ;;  %v125_v29 = vxor.u32 2147483648, %v267_v27 }
  0xce   :  { %v122_v30 = vxor.u32 2147483648, %v269_v28 }
  0xcf   :  { %v231_v31 = vsel %vm229_vm11, %v125_v29, %v269_v28  ;;  %v126_v9 = vsel %vm124_vm9, %v125_v29, %v269_v28 }
  0xd0   :  { %v228_v32 = vsel %vm226_vm13, %v267_v27, %v122_v30  ;;  %v123_v33 = vsel %vm121_vm12, %v267_v27, %v122_v30 }
  0xd1   :  { %v232_v34 = vsel %vm225_vm15, %v228_v32, %v231_v31  ;;  %v127_v35 = vsel %vm120_vm14, %v123_v33, %v126_v9 }
  0xd2   :  { %v233_v36 = vsel %vm117_vm0, nan, %v232_v34  ;;  %v128_v37 = vsel %vm117_vm0, nan, %v127_v35 }
  0xd3   :  { %235 = vrot.lane.b32.xlu0 %v233_v36, %s277_s0  ;;  %130 = vst.msk [vmem:[%s329_s2] sm:$0xff] %vm129_vm10, %v128_v37 }
 0x145   :  { %v236_v38 = vpop.permute.xlu0 %235 }
 0x146   :  { %239 = vst.msk [vmem:[%s329_s2] sm:$0xff] %vm238_vm1, %v236_v38 }

</bundles_post_ra>
